<compile_context>
chip_gen: v5e
topology: v5e:2x2
jax: 0.10.0
libtpu: 0.0.40
codegen_flags: <defaults>
</compile_context>

<pallas_src>
import jax
import jax.numpy as jnp
from jax.experimental import pallas as pl
from jax.experimental.pallas import tpu as pltpu

_LANES = 128  # lane-dense width of the merged input / output slabs


# ----------------------------------------------------------------------------
# Fused kernel: softmax -> critic MLP -> in-kernel gather -> closed tour length
# ----------------------------------------------------------------------------
def _solver_fused_kernel(slab_ref, coords_ref, w_ref, out_ref):
    B, N, _ = coords_ref.shape          # coords: [B, N, 2]  (cities on sublanes)
    L = out_ref.shape[-1]               # 128

    # ---- softmax over the full 128-lane row (padding lanes hold -1e30 -> 0) -
    logits = slab_ref[:, 0:1, :]                                  # [B, 1, L]
    mx = jnp.max(logits, axis=-1, keepdims=True)                  # [B, 1, 1]
    ex = jnp.exp(logits - mx)                                     # [B, 1, L]
    den = jnp.sum(ex, axis=-1, keepdims=True)                     # [B, 1, 1]
    probs = ex / den                                              # exact recip.

    # ---- critic MLP entirely on the VPU (shapes far too small for the MXU) -
    # weight slab columns: [0..N-1]=w1^T, [N]=b1, [N+1]=w2, [N+2]=b2
    p = probs[:, :, 0:N]                                          # [B, 1, N]
    w1t = w_ref[:, 0:N]                                           # [H, N]
    b1 = w_ref[:, N:N + 1]                                        # [H, 1]
    w2 = w_ref[:, N + 1:N + 2]                                    # [H, 1]
    b2 = w_ref[0:1, N + 2:N + 3]                                  # [1, 1]
    h = jnp.sum(p * w1t, axis=-1, keepdims=True) + b1             # [B, H, 1]
    h = jnp.maximum(h, 0.0)
    value = jnp.sum(h * w2, axis=1, keepdims=True) + b2           # [B, 1, 1]

    # ---- closed tour length via signed one-hot incidence (no `next` input) -
    # sel[b, j, i]     = 1  iff city j is visited at tour position i
    # sel_nxt[b, j, i] = 1  iff city j is visited at position (i+1) mod N
    # (successor derived from the inverse permutation -> no data rotation)
    act = slab_ref[:, 1:2, 0:N]                                   # [B, 1, N] f32 ids
    city = jax.lax.broadcasted_iota(jnp.int32, (B, N, N), 1)      # city j (sublanes)
    pos = jax.lax.broadcasted_iota(jnp.int32, (B, N, N), 2)       # pos i (lanes)
    sel = (act == city.astype(jnp.float32)).astype(jnp.float32)   # [B, N, N]
    posf = pos.astype(jnp.float32)
    pos_of = jnp.sum(sel * posf, axis=2, keepdims=True)           # [B, N, 1] pos of city j
    nxtf = jnp.where(pos == N - 1, 0, pos + 1).astype(jnp.float32)
    sel_nxt = (pos_of == nxtf).astype(jnp.float32)                # [B, N, N]
    inc = sel - sel_nxt                                           # signed incidence
    dx = jnp.sum(inc * coords_ref[:, :, 0:1], axis=1, keepdims=True)   # [B, 1, N]
    dy = jnp.sum(inc * coords_ref[:, :, 1:2], axis=1, keepdims=True)   # [B, 1, N]
    seg = jnp.sqrt(dx * dx + dy * dy)                             # one sqrt pass
    r = jnp.sum(seg, axis=-1, keepdims=True)                      # [B, 1, 1]

    # ---- single lane-dense output: lanes 0..N-1 = probs, N = R, N+1 = value -
    lane = jax.lax.broadcasted_iota(jnp.int32, (B, 1, L), 2)
    out_ref[...] = jnp.where(lane == N, r, jnp.where(lane == N + 1, value, probs))


def _fused_call(slab, coords, wslab):
    B, N, _ = coords.shape
    H, W = wslab.shape

    return pl.pallas_call(
        _solver_fused_kernel,
        out_shape=jax.ShapeDtypeStruct((B, 1, _LANES), jnp.float32),
        grid=(1,),
        in_specs=[
            pl.BlockSpec((B, 2, _LANES), lambda i: (0, 0, 0)),   # logits|actions slab
            pl.BlockSpec((B, N, 2), lambda i: (0, 0, 0)),        # raw coordinates
            pl.BlockSpec((H, W), lambda i: (0, 0)),              # critic weight slab
        ],
        out_specs=pl.BlockSpec((B, 1, _LANES), lambda i: (0, 0, 0)),
        compiler_params=pltpu.CompilerParams(
            # Scale-up: grid over batch with "parallel" for v7x's 2 TensorCores.
            dimension_semantics=("arbitrary",)),
    )(slab, coords, wslab)


# ----------------------------------------------------------------------------
# Solver.forward equivalent
# ----------------------------------------------------------------------------
def solver_forward(inputs, params):
    """inputs: [B, seq_len, 2] f32  ->  (R, probs, actions, value)"""
    B, N, _ = inputs.shape
    H = params["w1"].shape[1]
    assert N + 2 <= _LANES, "output slab needs N+2 lanes"

    # --- actor stand-in (plain-JAX glue; reference module leaves actor=None) --
    # TODO(synk): real pointer-net actor unavailable; deterministic score
    #             ordering (argsort) stands in for the sampled tour; argsort
    #             has no clean in-kernel Pallas equivalent.
    logits = jnp.einsum("bnc,c->bn", inputs, params["wa"])           # [B, N]
    actions = jnp.argsort(-logits, axis=-1).astype(jnp.int32)        # [B, N]

    # --- merged lane-dense input slab: row 0 = logits (padded -1e30), row 1 = actions
    pad = _LANES - N
    logits_w = jnp.pad(logits.astype(jnp.float32), ((0, 0), (0, pad)),
                       constant_values=-1e30)
    act_w = jnp.pad(actions.astype(jnp.float32), ((0, 0), (0, pad)))
    slab = jnp.stack([logits_w, act_w], axis=1)                      # [B, 2, 128]

    # --- merged critic weight slab [H, N+3]: w1^T | b1 | w2 | b2 --------------
    wslab = jnp.concatenate(
        [params["w1"].T,                                             # [H, N]
         params["b1"].T,                                             # [H, 1]
         params["w2"],                                               # [H, 1]
         jnp.broadcast_to(params["b2"].reshape(1, 1), (H, 1))],      # [H, 1]
        axis=1).astype(jnp.float32)

    rv = _fused_call(slab, inputs.astype(jnp.float32), wslab)        # [B, 1, 128]

    probs = rv[:, 0, :N]                                             # [B, N]
    R = rv[:, 0, N]                                                  # [B]
    value = rv[:, 0, N + 1]                                          # [B]
    return R, probs, actions, value


def init_params(key, seq_len, hidden):
    k1, k2, k3 = jax.random.split(key, 3)
    return {
        "wa": jax.random.normal(k1, (2,), jnp.float32),
        "w1": jax.random.normal(k2, (seq_len, hidden), jnp.float32) * 0.1,
        "b1": jnp.zeros((1, hidden), jnp.float32),
        "w2": jax.random.normal(k3, (hidden, 1), jnp.float32) * 0.1,
        "b2": jnp.zeros((1,), jnp.float32),
    }


if __name__ == "__main__":
    B, N, H = 4, 8, 32
    key = jax.random.PRNGKey(0)
    k_in, k_p = jax.random.split(key)
    inputs = jax.random.uniform(k_in, (B, N, 2), jnp.float32)   # [batch, seq_len, 2]
    params = init_params(k_p, N, H)

    R, probs, actions, value = jax.jit(solver_forward)(inputs, params)
    jax.block_until_ready((R, probs, actions, value))

    # shapes match the torch forward contract
    assert R.shape == (B,)
    assert probs.shape == (B, N)
    assert actions.shape == (B, N)
    assert value.shape == (B,)

    # numerical check of the fused reward path against a plain-JAX reference
    idx = jnp.repeat(actions[:, :, None], 2, axis=2)
    tour = jnp.take_along_axis(inputs, idx, axis=1)
    diffs = tour - jnp.roll(tour, shift=-1, axis=1)
    R_ref = jnp.sum(jnp.linalg.norm(diffs, axis=-1), axis=-1)
    assert jnp.allclose(R, R_ref, atol=1e-4), (R, R_ref)

    # probs / value reference
    logits_ref = jnp.einsum("bnc,c->bn", inputs, params["wa"])
    probs_ref = jax.nn.softmax(logits_ref, axis=-1)
    h_ref = jnp.maximum(probs_ref @ params["w1"] + params["b1"], 0.0)
    value_ref = (h_ref @ params["w2"])[:, 0] + params["b2"][0]
    assert jnp.allclose(probs, probs_ref, atol=1e-3), (probs, probs_ref)
    assert jnp.allclose(value, value_ref, atol=1e-3), (value, value_ref)

    print("KERNEL_OK")
</pallas_src>

<mosaic_0001>
module attributes {stable_mosaic.version = 11 : i64} {
  func.func @_solver_fused_kernel(%arg0: i32, %arg1: memref<4x2x128xf32, #tpu.memory_space<vmem>>, %arg2: memref<4x8x2xf32, #tpu.memory_space<vmem>>, %arg3: memref<32x11xf32, #tpu.memory_space<vmem>>, %arg4: memref<4x1x128xf32, #tpu.memory_space<vmem>>) attributes {dimension_semantics = [#tpu.dimension_semantics<arbitrary>], iteration_bounds = array<i64: 1>, scalar_prefetch = 0 : i64, scratch_operands = 0 : i64, tpu.core_type = #tpu.core_type<tc>, window_params = [{pipeline_mode = #tpu.pipeline_mode<synchronous>, transform_indices = @transform_0, window_bounds = array<i64: 4, 2, 128>}, {pipeline_mode = #tpu.pipeline_mode<synchronous>, transform_indices = @transform_1, window_bounds = array<i64: 4, 8, 2>}, {pipeline_mode = #tpu.pipeline_mode<synchronous>, transform_indices = @transform_2, window_bounds = array<i64: 32, 11>}, {pipeline_mode = #tpu.pipeline_mode<synchronous>, transform_indices = @transform_3, window_bounds = array<i64: 4, 1, 128>}]} {
    %c0 = arith.constant 0 : index
    %c0_0 = arith.constant 0 : index
    %c0_1 = arith.constant 0 : index
    %0 = vector.load %arg1[%c0, %c0_0, %c0_1] : memref<4x2x128xf32, #tpu.memory_space<vmem>>, vector<4x1x128xf32>
    %cst = arith.constant dense<0xFF800000> : vector<4x1xf32>
    %1 = vector.multi_reduction <maximumf>, %0, %cst [2] : vector<4x1x128xf32> to vector<4x1xf32>
    %2 = vector.shape_cast %1 : vector<4x1xf32> to vector<4x1x1xf32>
    %3 = vector.broadcast %2 : vector<4x1x1xf32> to vector<4x1x128xf32>
    %4 = arith.subf %0, %3 : vector<4x1x128xf32>
    %5 = math.exp %4 : vector<4x1x128xf32>
    %cst_2 = arith.constant dense<0.000000e+00> : vector<4x1xf32>
    %6 = vector.multi_reduction <add>, %5, %cst_2 [2] : vector<4x1x128xf32> to vector<4x1xf32>
    %7 = vector.shape_cast %6 : vector<4x1xf32> to vector<4x1x1xf32>
    %8 = vector.broadcast %7 : vector<4x1x1xf32> to vector<4x1x128xf32>
    %9 = arith.divf %5, %8 : vector<4x1x128xf32>
    %10 = vector.extract_strided_slice %9 {offsets = [0, 0, 0], sizes = [4, 1, 8], strides = [1, 1, 1]} : vector<4x1x128xf32> to vector<4x1x8xf32>
    %c0_3 = arith.constant 0 : index
    %c0_4 = arith.constant 0 : index
    %11 = vector.load %arg3[%c0_3, %c0_4] : memref<32x11xf32, #tpu.memory_space<vmem>>, vector<32x8xf32>
    %c0_5 = arith.constant 0 : index
    %c8 = arith.constant 8 : index
    %12 = vector.load %arg3[%c0_5, %c8] : memref<32x11xf32, #tpu.memory_space<vmem>>, vector<32x1xf32>
    %c0_6 = arith.constant 0 : index
    %c9 = arith.constant 9 : index
    %13 = vector.load %arg3[%c0_6, %c9] : memref<32x11xf32, #tpu.memory_space<vmem>>, vector<32x1xf32>
    %c0_7 = arith.constant 0 : index
    %c10 = arith.constant 10 : index
    %14 = vector.load %arg3[%c0_7, %c10] : memref<32x11xf32, #tpu.memory_space<vmem>>, vector<1x1xf32>
    %15 = vector.shape_cast %11 : vector<32x8xf32> to vector<1x32x8xf32>
    %16 = vector.broadcast %10 : vector<4x1x8xf32> to vector<4x32x8xf32>
    %17 = vector.broadcast %15 : vector<1x32x8xf32> to vector<4x32x8xf32>
    %18 = arith.mulf %16, %17 : vector<4x32x8xf32>
    %cst_8 = arith.constant dense<0.000000e+00> : vector<4x32xf32>
    %19 = vector.multi_reduction <add>, %18, %cst_8 [2] : vector<4x32x8xf32> to vector<4x32xf32>
    %20 = vector.shape_cast %19 : vector<4x32xf32> to vector<4x32x1xf32>
    %21 = vector.shape_cast %12 : vector<32x1xf32> to vector<1x32x1xf32>
    %22 = vector.broadcast %21 : vector<1x32x1xf32> to vector<4x32x1xf32>
    %23 = arith.addf %20, %22 : vector<4x32x1xf32>
    %cst_9 = arith.constant 0.000000e+00 : f32
    %24 = vector.broadcast %cst_9 : f32 to vector<4x32x1xf32>
    %25 = arith.maximumf %23, %24 : vector<4x32x1xf32>
    %26 = vector.shape_cast %13 : vector<32x1xf32> to vector<1x32x1xf32>
    %27 = vector.broadcast %26 : vector<1x32x1xf32> to vector<4x32x1xf32>
    %28 = arith.mulf %25, %27 : vector<4x32x1xf32>
    %cst_10 = arith.constant dense<0.000000e+00> : vector<4x1xf32>
    %29 = vector.multi_reduction <add>, %28, %cst_10 [1] : vector<4x32x1xf32> to vector<4x1xf32>
    %30 = vector.shape_cast %29 : vector<4x1xf32> to vector<4x1x1xf32>
    %31 = vector.shape_cast %14 : vector<1x1xf32> to vector<1x1x1xf32>
    %32 = vector.broadcast %31 : vector<1x1x1xf32> to vector<4x1x1xf32>
    %33 = arith.addf %30, %32 : vector<4x1x1xf32>
    %c0_11 = arith.constant 0 : index
    %c1 = arith.constant 1 : index
    %c0_12 = arith.constant 0 : index
    %34 = vector.load %arg1[%c0_11, %c1, %c0_12] : memref<4x2x128xf32, #tpu.memory_space<vmem>>, vector<4x1x8xf32>
    %35 = tpu.iota {dimensions = array<i32: 1>} : vector<4x8x8xi32>
    %36 = tpu.iota {dimensions = array<i32: 2>} : vector<4x8x8xi32>
    %37 = arith.sitofp %35 : vector<4x8x8xi32> to vector<4x8x8xf32>
    %38 = vector.broadcast %34 : vector<4x1x8xf32> to vector<4x8x8xf32>
    %39 = arith.cmpf oeq, %38, %37 : vector<4x8x8xf32>
    %40 = arith.extui %39 : vector<4x8x8xi1> to vector<4x8x8xi32>
    %41 = arith.sitofp %40 : vector<4x8x8xi32> to vector<4x8x8xf32>
    %42 = arith.sitofp %36 : vector<4x8x8xi32> to vector<4x8x8xf32>
    %43 = arith.mulf %41, %42 : vector<4x8x8xf32>
    %cst_13 = arith.constant dense<0.000000e+00> : vector<4x8xf32>
    %44 = vector.multi_reduction <add>, %43, %cst_13 [2] : vector<4x8x8xf32> to vector<4x8xf32>
    %45 = vector.shape_cast %44 : vector<4x8xf32> to vector<4x8x1xf32>
    %c7_i32 = arith.constant 7 : i32
    %46 = vector.broadcast %c7_i32 : i32 to vector<4x8x8xi32>
    %47 = arith.cmpi eq, %36, %46 : vector<4x8x8xi32>
    %c1_i32 = arith.constant 1 : i32
    %48 = vector.broadcast %c1_i32 : i32 to vector<4x8x8xi32>
    %49 = arith.addi %36, %48 : vector<4x8x8xi32>
    %c0_i32 = arith.constant 0 : i32
    %50 = vector.broadcast %c0_i32 : i32 to vector<4x8x8xi32>
    %51 = arith.select %47, %50, %49 : vector<4x8x8xi1>, vector<4x8x8xi32>
    %52 = arith.sitofp %51 : vector<4x8x8xi32> to vector<4x8x8xf32>
    %53 = vector.broadcast %45 : vector<4x8x1xf32> to vector<4x8x8xf32>
    %54 = arith.cmpf oeq, %53, %52 : vector<4x8x8xf32>
    %55 = arith.extui %54 : vector<4x8x8xi1> to vector<4x8x8xi32>
    %56 = arith.sitofp %55 : vector<4x8x8xi32> to vector<4x8x8xf32>
    %57 = arith.subf %41, %56 : vector<4x8x8xf32>
    %c0_14 = arith.constant 0 : index
    %c0_15 = arith.constant 0 : index
    %c0_16 = arith.constant 0 : index
    %58 = vector.load %arg2[%c0_14, %c0_15, %c0_16] : memref<4x8x2xf32, #tpu.memory_space<vmem>>, vector<4x8x1xf32>
    %59 = vector.broadcast %58 : vector<4x8x1xf32> to vector<4x8x8xf32>
    %60 = arith.mulf %57, %59 : vector<4x8x8xf32>
    %cst_17 = arith.constant dense<0.000000e+00> : vector<4x8xf32>
    %61 = vector.multi_reduction <add>, %60, %cst_17 [1] : vector<4x8x8xf32> to vector<4x8xf32>
    %62 = vector.shape_cast %61 : vector<4x8xf32> to vector<4x1x8xf32>
    %c0_18 = arith.constant 0 : index
    %c0_19 = arith.constant 0 : index
    %c1_20 = arith.constant 1 : index
    %63 = vector.load %arg2[%c0_18, %c0_19, %c1_20] : memref<4x8x2xf32, #tpu.memory_space<vmem>>, vector<4x8x1xf32>
    %64 = vector.broadcast %63 : vector<4x8x1xf32> to vector<4x8x8xf32>
    %65 = arith.mulf %57, %64 : vector<4x8x8xf32>
    %cst_21 = arith.constant dense<0.000000e+00> : vector<4x8xf32>
    %66 = vector.multi_reduction <add>, %65, %cst_21 [1] : vector<4x8x8xf32> to vector<4x8xf32>
    %67 = vector.shape_cast %66 : vector<4x8xf32> to vector<4x1x8xf32>
    %68 = arith.mulf %62, %62 : vector<4x1x8xf32>
    %69 = arith.mulf %67, %67 : vector<4x1x8xf32>
    %70 = arith.addf %68, %69 : vector<4x1x8xf32>
    %71 = math.sqrt %70 : vector<4x1x8xf32>
    %cst_22 = arith.constant dense<0.000000e+00> : vector<4x1xf32>
    %72 = vector.multi_reduction <add>, %71, %cst_22 [2] : vector<4x1x8xf32> to vector<4x1xf32>
    %73 = vector.shape_cast %72 : vector<4x1xf32> to vector<4x1x1xf32>
    %74 = tpu.iota {dimensions = array<i32: 2>} : vector<4x1x128xi32>
    %c8_i32 = arith.constant 8 : i32
    %75 = vector.broadcast %c8_i32 : i32 to vector<4x1x128xi32>
    %76 = arith.cmpi eq, %74, %75 : vector<4x1x128xi32>
    %c9_i32 = arith.constant 9 : i32
    %77 = vector.broadcast %c9_i32 : i32 to vector<4x1x128xi32>
    %78 = arith.cmpi eq, %74, %77 : vector<4x1x128xi32>
    %79 = vector.shape_cast %33 : vector<4x1x1xf32> to vector<4x1x1xf32>
    %80 = vector.broadcast %79 : vector<4x1x1xf32> to vector<4x1x128xf32>
    %81 = arith.select %78, %80, %9 : vector<4x1x128xi1>, vector<4x1x128xf32>
    %82 = vector.shape_cast %73 : vector<4x1x1xf32> to vector<4x1x1xf32>
    %83 = vector.broadcast %82 : vector<4x1x1xf32> to vector<4x1x128xf32>
    %84 = arith.select %76, %83, %81 : vector<4x1x128xi1>, vector<4x1x128xf32>
    %c0_23 = arith.constant 0 : index
    %c0_24 = arith.constant 0 : index
    %c0_25 = arith.constant 0 : index
    %85 = vector.load %arg4[%c0_23, %c0_24, %c0_25] : memref<4x1x128xf32, #tpu.memory_space<vmem>>, vector<4x1x128xf32>
    tpu.vector_store %arg4[%c0_23, %c0_24, %c0_25], %84 {strides = array<i32>} : memref<4x1x128xf32, #tpu.memory_space<vmem>>, vector<4x1x128xf32>,
    return
  }
  func.func @transform_0(%arg0: i32) -> (i32, i32, i32) {
    %c0_i32 = arith.constant 0 : i32
    %c0_i32_0 = arith.constant 0 : i32
    %c0_i32_1 = arith.constant 0 : i32
    %c0_i32_2 = arith.constant 0 : i32
    return %c0_i32, %c0_i32_0, %c0_i32_1 : i32, i32, i32
  }
  func.func @transform_1(%arg0: i32) -> (i32, i32, i32) {
    %c0_i32 = arith.constant 0 : i32
    %c0_i32_0 = arith.constant 0 : i32
    %c0_i32_1 = arith.constant 0 : i32
    %c0_i32_2 = arith.constant 0 : i32
    return %c0_i32, %c0_i32_0, %c0_i32_1 : i32, i32, i32
  }
  func.func @transform_2(%arg0: i32) -> (i32, i32) {
    %c0_i32 = arith.constant 0 : i32
    %c0_i32_0 = arith.constant 0 : i32
    %c0_i32_1 = arith.constant 0 : i32
    return %c0_i32, %c0_i32_0 : i32, i32
  }
  func.func @transform_3(%arg0: i32) -> (i32, i32, i32) {
    %c0_i32 = arith.constant 0 : i32
    %c0_i32_0 = arith.constant 0 : i32
    %c0_i32_1 = arith.constant 0 : i32
    %c0_i32_2 = arith.constant 0 : i32
    return %c0_i32, %c0_i32_0, %c0_i32_1 : i32, i32, i32
  }
}

</mosaic_0001>

<bundles_post_ra>
// kernel: neg.1
= control target key start
LH: loop header
LB: loop body
LE: loop exit
PB: predicated region body
PF: predicated region fallthrough
CT: control target
= control target key end

     0   :  { %s24_s0 = inlined_call_operand.vmem [shape: f32[4,8], index: 0, kind: input, shape index: {}]   ;;  %s25_s1 = inlined_call_operand.vmem [shape: f32[4,8], index: 1, kind: output, shape index: {}]  }
   0x1   :  { %v2_v0 = vld [vmem:[%s24_s0] sm:$0xf] }
   0x2   :  { %v5_v1 = vxor.u32 2147483648, %v2_v0 }
   0x4   :  { %7 = vst [vmem:[%s25_s1] sm:$0xf] %v5_v1 }

// kernel: solver_forward.1
= control target key start
LH: loop header
LB: loop body
LE: loop exit
PB: predicated region body
PF: predicated region fallthrough
CT: control target
= control target key end

     0   :  { %vm18_vm0 = vcmask 1040384   ;;  %s643_s18 = smov 127   ;;  %s644_s25 = smov 126   ;;  %v645_v10 = vmov 0   ;;  %v318_v11 = vlaneseq  ;;  %v646_v20 = vmov 0.0   ;;  %s1048_s2 = inlined_call_operand.vmem [shape: f32[32,11], index: 2, kind: input, shape index: {}]   ;;  %s1049_s0 = inlined_call_operand.vmem [shape: f32[4,2,128], index: 0, kind: input, shape index: {}]   ;;  %s1050_s1 = inlined_call_operand.vmem [shape: f32[4,8,2], index: 1, kind: input, shape index: {}]   ;;  %s1051_s3 = inlined_call_operand.vmem [shape: f32[4,1,128], index: 3, kind: output, shape index: {}]  }
   0x1   :  { %v672_v0 = vld [vmem:[%s1048_s2 + $0x10] sm:$0xff]  ;;  %v677_v1 = vld [vmem:[%s1049_s0 + $0x4] sm:$0x1]  ;;  %v682_v2 = vld [vmem:[%s1049_s0] sm:$0x1]  ;;  %607 = vset.pattern.permute.xlu2 %v645_v10  ;;  %606 = vset.pattern.permute.xlu0 %v645_v10  ;;  %vm140_vm2 = vcmask 64512  }
   0x2   :  { %229 = vrot.lane.b32.xlu2 %v672_v0, %s643_s18  ;;  %v25_v3 = vsel %vm18_vm0, %v677_v1, -inf  ;;  %v19_v4 = vsel %vm18_vm0, %v682_v2, -inf  ;;  %v692_v5 = vld [vmem:[%s1049_s0 + $0x6] sm:$0x1]  ;;  %v697_v6 = vld [vmem:[%s1049_s0 + $0x2] sm:$0x1]  ;;  %608 = vset.pattern.permute.xlu1 %v645_v10 }
   0x3   :  { %26 = vmax.xlane.f32.xlu1 %v25_v3  ;;  %20 = vmax.xlane.f32.xlu0 %v19_v4  ;;  %v119_v7 = vld [vmem:[%s1048_s2] sm:$0x1]  ;;  %v28_v8 = vsel %vm18_vm0, %v692_v5, -inf  ;;  %v22_v9 = vsel %vm18_vm0, %v697_v6, -inf  ;;  %v319_v13 = vshrl.u32 %v318_v11, 7  ;;  %v715_v14 = vld [vmem:[%s1048_s2 + $0x8] sm:$0xff] }
   0x4   :  { %v709_v12 = vld [vmem:[%s1048_s2] sm:$0xff]  ;;  %v724_v17 = vld [vmem:[%s1048_s2 + $0x18] sm:$0xff]  ;;  %v726_v18 = vand.u32 127, %v318_v11  ;;  %v754_v30 = vld [vmem:[%s1050_s1 + $0x8] sm:$0xff]  ;;  %v647_v38 = vmov 1  }
   0x5   :  { %v322_v15 = vcvt.s32.f32 %v319_v13  ;;  %v615_v16 = vld [vmem:[%s1049_s0 + $0x5] ss:$0 sm:$0xff]  ;;  %v616_v24 = vld [vmem:[%s1049_s0 + $0x1] ss:$0 sm:$0xff]  ;;  %v617_v25 = vld [vmem:[%s1049_s0 + $0x3] ss:$0 sm:$0xff] }
   0x6   :  { %v339_v19 = vcvt.s32.f32 %v726_v18  ;;  %v618_v27 = vld [vmem:[%s1049_s0 + $0x7] ss:$0 sm:$0xff]  ;;  %v767_v36 = vld [vmem:[%s1050_s1 + $0x18] sm:$0xff]  ;;  %v777_v40 = vld [vmem:[%s1050_s1 + $0x10] sm:$0xff]  ;;  %v357_v60 = vadd.s32 1, %v726_v18  ;;  %vm356_vm6 = vcmp.eq.s32.totalorder %v726_v18, 7 }
   0x7   :  { %vm329_vm1 = vcmp.eq.f32.partialorder %v615_v16, %v322_v15  ;;  %vm327_vm3 = vcmp.eq.f32.partialorder %v616_v24, %v322_v15  ;;  %vm328_vm4 = vcmp.eq.f32.partialorder %v617_v25, %v322_v15  ;;  %vm330_vm5 = vcmp.eq.f32.partialorder %v618_v27, %v322_v15  ;;  %v376_v39 = vld [vmem:[%s1050_s1] sm:$0xff] }
   0x8   :  { %v731_v21 = vsel %vm329_vm1, 1.0, %v646_v20  ;;  %v742_v26 = vsel %vm327_vm3, 1.0, %v646_v20  ;;  %v749_v29 = vsel %vm328_vm4, 1.0, %v646_v20  ;;  %v760_v33 = vsel %vm330_vm5, 1.0, %v646_v20 }
   0x9   :  { %v342_v22 = vmul.f32 %v731_v21, %v339_v19  ;;  %v340_v28 = vmul.f32 %v742_v26, %v339_v19  ;;  %v341_v31 = vmul.f32 %v749_v29, %v339_v19  ;;  %v343_v35 = vmul.f32 %v760_v33, %v339_v19 }
   0xa   :  { %307 = vrot.lane.b32.xlu2 %v119_v7, %s644_s25  ;;  %v594_v63 = vcvt.s32.f32 %v357_v60 }
   0xb   :  { %29 = vmax.xlane.f32.xlu1 %v28_v8  ;;  %23 = vmax.xlane.f32.xlu0 %v22_v9  ;;  %v350_v23 = vsel %vm140_vm2, %v342_v22, 0.0  ;;  %v344_v32 = vsel %vm140_vm2, %v340_v28, 0.0  ;;  %v347_v34 = vsel %vm140_vm2, %v341_v31, 0.0  ;;  %v353_v37 = vsel %vm140_vm2, %v343_v35, 0.0 }
  0x1f   :  { %225 = vrot.lane.b32.xlu0 %v709_v12, %s643_s18 }
  0x24   :  { %227 = vrot.lane.b32.xlu1 %v715_v14, %s643_s18 }
  0x27   :  { %231 = vrot.lane.b32.xlu0 %v724_v17, %s643_s18 }
  0x33   :  { %351 = vadd.xlane.f32.xlu2 %v350_v23 }
  0x4b   :  { %387 = vperm.xlu2 %607, %v754_v30  }
  0x4e   :  { %345 = vadd.xlane.f32.xlu1 %v344_v32 }
  0x51   :  { %348 = vadd.xlane.f32.xlu0 %v347_v34 }
  0x53   :  { %397 = vperm.xlu2 %607, %v767_v36  }
  0x56   :  { %354 = vadd.xlane.f32.xlu1 %v353_v37 }
  0x5b   :  { %610 = vset.pattern.permute.xlu2 %v647_v38 }
  0x5c   :  { %v796_v58 = vpop.permute.xlu2 %229 }
  0x64   :  { %v801_v62 = vpop.permute.xlu2 %307 }
  0x65   :  { %382 = vperm.xlu0 %606, %v376_v39  }
  0x6d   :  { %611 = vset.pattern.permute.xlu0 %v647_v38 }
  0x6f   :  { %392 = vperm.xlu1 %608, %v777_v40  }
  0x76   :  { %v21_v41 = vpop.xlane.xlu0 %20  ;;  %v27_v44 = vpop.xlane.xlu1 %26 }
  0x77   :  { %v31_v42 = vsub.f32 %v682_v2, %v21_v41  ;;  %609 = vset.pattern.permute.xlu1 %v647_v38  ;;  %v33_v45 = vsub.f32 %v677_v1, %v27_v44  ;;  %v595_v2 = vsel %vm356_vm6, 0.0, %v594_v63 }
  0x78   :  { %433 = vperm.xlu1 %609, %v376_v39  }
  0x79   :  { %v35_v43 = vmul.f32 1.442695, %v31_v42  ;;  %v39_v49 = vmul.f32 1.442695, %v33_v45 }
  0x7b   :  { %619 = vpow2.f32 %v35_v43 }
  0x7e   :  { %v24_v46 = vpop.xlane.xlu0 %23  ;;  %v30_v55 = vpop.xlane.xlu1 %29 }
  0x7f   :  { %v32_v47 = vsub.f32 %v697_v6, %v24_v46  ;;  %v34_v57 = vsub.f32 %v692_v5, %v30_v55 }
  0x81   :  { %v783_v48 = vpop.eup %619  ;;  %v37_v50 = vmul.f32 1.442695, %v32_v47  ;;  %v41_v59 = vmul.f32 1.442695, %v34_v57 }
  0x82   :  { %v43_v51 = vsel %vm18_vm0, %v783_v48, 0.0 }
  0x83   :  { %621 = vpow2.f32 %v37_v50  ;;  %44 = vadd.xlane.f32.xlu2 %v43_v51 }
  0x84   :  { %623 = vpow2.f32 %v39_v49 }
  0x85   :  { %625 = vpow2.f32 %v41_v59 }
  0x89   :  { %v787_v52 = vpop.eup %621 }
  0x8a   :  { %v46_v53 = vsel %vm18_vm0, %v787_v52, 0.0  ;;  %v791_v54 = vpop.eup %623 }
  0x8b   :  { %47 = vadd.xlane.f32.xlu2 %v46_v53  ;;  %v49_v56 = vsel %vm18_vm0, %v791_v54, 0.0  ;;  %v799_v61 = vpop.eup %625 }
  0x8c   :  { %v52_v1 = vsel %vm18_vm0, %v799_v61, 0.0 }
  0x8f   :  { %50 = vadd.xlane.f32.xlu0 %v49_v56 }
  0x91   :  { %v806_v4 = vpop.permute.xlu0 %225 }
  0x96   :  { %v808_v5 = vpop.permute.xlu1 %227 }
  0x99   :  { %v810_v6 = vpop.permute.xlu0 %231 }
  0xa2   :  { %53 = vadd.xlane.f32.xlu1 %v52_v1 }
  0xa6   :  { %v352_v3 = vpop.xlane.xlu2 %351 }
  0xa7   :  { %vm362_vm7 = vcmp.eq.f32.partialorder %v352_v3, %v595_v2 }
  0xae   :  { %v388_v8 = vpop.permute.xlu2 %387 }
  0xb6   :  { %v398_v22 = vpop.permute.xlu2 %397 }
  0xc1   :  { %v346_v7 = vpop.xlane.xlu1 %345 }
  0xc2   :  { %vm360_vm10 = vcmp.eq.f32.partialorder %v346_v7, %v595_v2 }
  0xc3   :  { %v596_v24 = vsel %vm360_vm10, 1.0, %v646_v20 }
  0xc4   :  { %v349_v9 = vpop.xlane.xlu0 %348  ;;  %v372_v25 = vsub.f32 %v742_v26, %v596_v24 }
  0xc5   :  { %vm361_vm8 = vcmp.eq.f32.partialorder %v349_v9, %v595_v2 }
  0xc6   :  { %v597_v10 = vsel %vm361_vm8, 1.0, %v646_v20 }
  0xc7   :  { %v814_v11 = vsub.f32 %v749_v29, %v597_v10  ;;  %v598_v29 = vsel %vm362_vm7, 1.0, %v646_v20 }
  0xc8   :  { %v832_v32 = vsub.f32 %v731_v21, %v598_v29 }
  0xc9   :  { %v355_v13 = vpop.xlane.xlu1 %354  ;;  %v817_v15 = vmul.f32 %v388_v8, %v814_v11 }
  0xca   :  { %vm363_vm9 = vcmp.eq.f32.partialorder %v355_v13, %v595_v2 }
  0xcb   :  { %v599_v16 = vsel %vm363_vm9, 1.0, %v646_v20 }
  0xcc   :  { %v821_v19 = vsub.f32 %v760_v33, %v599_v16 }
  0xce   :  { %v824_v23 = vmul.f32 %v398_v22, %v821_v19 }
  0xd7   :  { %v383_v27 = vpop.permute.xlu0 %382 }
  0xd8   :  { %v400_v28 = vmul.f32 %v383_v27, %v372_v25 }
  0xda   :  { %v404_v31 = vsel %vm140_vm2, %v400_v28, 0.0 }
  0xdb   :  { %v405_v34 = vrot.slane %v404_v31, 4 }
  0xdd   :  { %v406_v37 = vadd.f32 %v405_v34, %v404_v31 }
  0xdf   :  { %v407_v38 = vrot.slane %v406_v37, 2 }
  0xe1   :  { %v393_v33 = vpop.permute.xlu1 %392  ;;  %v408_v42 = vadd.f32 %v407_v38, %v406_v37 }
  0xe2   :  { %v835_v35 = vmul.f32 %v393_v33, %v832_v32 }
  0xe3   :  { %v409_v20 = vrot.slane %v408_v42, 1 }
  0xe5   :  { %v410_v47 = vadd.f32 %v409_v20, %v408_v42 }
  0xe7   :  { %v480_v51 = vmul.f32 %v410_v47, %v410_v47 }
  0xea   :  { %v434_v39 = vpop.permute.xlu1 %433 }
  0xeb   :  { %v448_v41 = vmul.f32 %v434_v39, %v372_v25 }
  0xed   :  { %v452_v26 = vsel %vm140_vm2, %v448_v41, 0.0 }
  0xee   :  { %v453_v43 = vrot.slane %v452_v26, 4 }
  0xf0   :  { %v454_v44 = vadd.f32 %v453_v43, %v452_v26 }
  0xf2   :  { %v455_v45 = vrot.slane %v454_v44, 2 }
  0xf4   :  { %v456_v46 = vadd.f32 %v455_v45, %v454_v44 }
  0xf6   :  { %v457_v21 = vrot.slane %v456_v46, 1  ;;  %v45_v49 = vpop.xlane.xlu2 %44 }
  0xf7   :  { %627 = vrcp.f32 %v45_v49  ;;  %v66_v63 = vand.u32 2147483648, %v45_v49  ;;  %v64_v2 = vand.u32 2147483647, %v45_v49  ;;  %vm60_vm12 = vweird.f32 %v45_v49 }
  0xf8   :  { %v458_v50 = vadd.f32 %v457_v21, %v456_v46 }
  0xf9   :  { %v67_v9 = vor.u32 1.1754944e-38, %v66_v63  ;;  %vm65_vm14 = vcmp.eq.f32.partialorder %v64_v2, 8.507059e+37 }
  0xfa   :  { %v484_v53 = vmul.f32 %v458_v50, %v458_v50 }
  0xfc   :  { %v838_v55 = vadd.f32 %v484_v53, %v480_v51 }
  0xfd   :  { %v628_v56 = vpop.eup %627 }
  0xfe   :  { %v56_v57 = vmul.f32 %v628_v56, %v45_v49  ;;  %v48_v59 = vpop.xlane.xlu2 %47  ;;  %vm61_vm11 = vweird.f32 %v628_v56 }
  0xff   :  { %629 = vrcp.f32 %v48_v59  ;;  %vm62_vm13 = vmor %vm60_vm12, %vm61_vm11  ;;  %v79_v22 = vand.u32 2147483647, %v48_v59  ;;  %v81_v24 = vand.u32 2147483648, %v48_v59  ;;  %vm75_vm0 = vweird.f32 %v48_v59 }
 0x100   :  { %v57_v60 = vsub.f32 1.0, %v56_v57  ;;  %vm499_vm12 = vcmp.eq.f32.partialorder %v838_v55, inf }
 0x101   :  { %vm80_vm1 = vcmp.eq.f32.partialorder %v79_v22, 8.507059e+37  ;;  %v82_v34 = vor.u32 1.1754944e-38, %v81_v24 }
 0x102   :  { %v58_v1 = vmul.f32 %v628_v56, %v57_v60  ;;  %v51_v3 = vpop.xlane.xlu0 %50 }
 0x103   :  { %631 = vrcp.f32 %v51_v3  ;;  %v96_v26 = vand.u32 2147483648, %v51_v3  ;;  %vm90_vm5 = vweird.f32 %v51_v3 }
 0x104   :  { %v59_v7 = vadd.f32 %v628_v56, %v58_v1 }
 0x105   :  { %v630_v8 = vpop.eup %629  ;;  %v97_v50 = vor.u32 1.1754944e-38, %v96_v26 }
 0x106   :  { %v63_v10 = vsel %vm62_vm13, %v628_v56, %v59_v7  ;;  %v71_v13 = vmul.f32 %v630_v8, %v48_v59  ;;  %vm76_vm15 = vweird.f32 %v630_v8  ;;  %vm501_vm13 = vcmp.eq.f32.partialorder %v838_v55, 0.0 }
 0x107   :  { %v68_v16 = vsel %vm65_vm14, %v67_v9, %v63_v10  ;;  %vm77_vm3 = vmor %vm75_vm0, %vm76_vm15  ;;  %vm253_vm14 = vcmask 72768  }
 0x108   :  { %v841_v25 = vmul.f32 %v783_v48, %v68_v16  ;;  %v72_v27 = vsub.f32 1.0, %v71_v13  ;;  %v94_v48 = vand.u32 2147483647, %v51_v3 }
 0x109   :  { %v632_v28 = vpop.eup %631 }
 0x10a   :  { %v73_v29 = vmul.f32 %v630_v8, %v72_v27  ;;  %v86_v31 = vmul.f32 %v632_v28, %v51_v3  ;;  %v120_v33 = vperm.slane %v841_v25, 0  ;;  %vm91_vm4 = vweird.f32 %v632_v28 }
 0x10b   :  { %vm92_vm6 = vmor %vm90_vm5, %vm91_vm4  ;;  %vm95_vm7 = vcmp.eq.f32.partialorder %v94_v48, 8.507059e+37 }
 0x10c   :  { %v74_v37 = vadd.f32 %v630_v8, %v73_v29  ;;  %v87_v38 = vsub.f32 1.0, %v86_v31  ;;  %v126_v39 = vmul.f32 %v120_v33, %v672_v0  ;;  %v125_v41 = vmul.f32 %v120_v33, %v715_v14 }
 0x10d   :  { %v124_v42 = vmul.f32 %v120_v33, %v709_v12  ;;  %v127_v57 = vmul.f32 %v120_v33, %v724_v17 }
 0x10e   :  { %v78_v43 = vsel %vm77_vm3, %v630_v8, %v74_v37  ;;  %v88_v44 = vmul.f32 %v632_v28, %v87_v38  ;;  %v147_v20 = vsel %vm140_vm2, %v126_v39, 0.0  ;;  %v144_v45 = vsel %vm140_vm2, %v125_v41, 0.0 }
 0x10f   :  { %v83_v46 = vsel %vm80_vm1, %v82_v34, %v78_v43  ;;  %148 = vadd.xlane.f32.xlu1 %v147_v20  ;;  %145 = vadd.xlane.f32.xlu0 %v144_v45  ;;  %v141_v47 = vsel %vm140_vm2, %v124_v42, 0.0  ;;  %v150_v1 = vsel %vm140_vm2, %v127_v57, 0.0 }
 0x110   :  { %v851_v21 = vmul.f32 %v787_v52, %v83_v46  ;;  %v89_v49 = vadd.f32 %v632_v28, %v88_v44  ;;  %142 = vadd.xlane.f32.xlu2 %v141_v47 }
 0x112   :  { %v93_v51 = vsel %vm92_vm6, %v632_v28, %v89_v49  ;;  %v121_v53 = vperm.slane %v851_v21, 0  ;;  %vm552_vm6 = vcmp.eq.s32.totalorder %v726_v18, 8 }
 0x113   :  { %v98_v56 = vsel %vm95_vm7, %v97_v50, %v93_v51 }
 0x114   :  { %v857_v59 = vmul.f32 %v791_v54, %v98_v56  ;;  %v129_v60 = vmul.f32 %v121_v53, %v715_v14  ;;  %v128_v52 = vmul.f32 %v121_v53, %v709_v12  ;;  %v130_v54 = vmul.f32 %v121_v53, %v672_v0 }
 0x115   :  { %v54_v63 = vpop.xlane.xlu1 %53  ;;  %v131_v10 = vmul.f32 %v121_v53, %v724_v17 }
 0x116   :  { %633 = vrcp.f32 %v54_v63  ;;  %v156_v2 = vsel %vm140_vm2, %v129_v60, 0.0  ;;  %v153_v3 = vsel %vm140_vm2, %v128_v52, 0.0  ;;  %v122_v7 = vperm.slane %v857_v59, 0 }
 0x117   :  { %157 = vadd.xlane.f32.xlu1 %v156_v2  ;;  %154 = vadd.xlane.f32.xlu0 %v153_v3  ;;  %v159_v22 = vsel %vm140_vm2, %v130_v54, 0.0  ;;  %v111_v27 = vand.u32 2147483648, %v54_v63  ;;  %v162_v28 = vsel %vm140_vm2, %v131_v10, 0.0  ;;  %v109_v31 = vand.u32 2147483647, %v54_v63 }
 0x118   :  { %151 = vadd.xlane.f32.xlu2 %v150_v1  ;;  %v132_v8 = vmul.f32 %v122_v7, %v709_v12  ;;  %vm105_vm9 = vweird.f32 %v54_v63  ;;  %v133_v34 = vmul.f32 %v122_v7, %v715_v14  ;;  %v135_v37 = vmul.f32 %v122_v7, %v724_v17 }
 0x119   :  { %v112_v38 = vor.u32 1.1754944e-38, %v111_v27  ;;  %v134_v39 = vmul.f32 %v122_v7, %v672_v0  ;;  %vm110_vm11 = vcmp.eq.f32.partialorder %v109_v31, 8.507059e+37  ;;  %635 = vrsqrt.f32 %v838_v55 }
 0x11a   :  { %v165_v24 = vsel %vm140_vm2, %v132_v8, 0.0  ;;  %v168_v42 = vsel %vm140_vm2, %v133_v34, 0.0  ;;  %v174_v43 = vsel %vm140_vm2, %v135_v37, 0.0 }
 0x11b   :  { %v171_v44 = vsel %vm140_vm2, %v134_v39, 0.0 }
 0x11c   :  { %v634_v9 = vpop.eup %633 }
 0x11d   :  { %v101_v13 = vmul.f32 %v634_v9, %v54_v63  ;;  %vm106_vm8 = vweird.f32 %v634_v9 }
 0x11e   :  { %vm107_vm10 = vmor %vm105_vm9, %vm106_vm8 }
 0x11f   :  { %v102_v16 = vsub.f32 1.0, %v101_v13  ;;  %166 = vadd.xlane.f32.xlu1 %v165_v24  ;;  %163 = vadd.xlane.f32.xlu0 %v162_v28  ;;  %v636_v56 = vpop.eup %635 }
 0x120   :  { %160 = vadd.xlane.f32.xlu2 %v159_v22  ;;  %v493_v57 = vmul.f32 %v636_v56, %v838_v55 }
 0x121   :  { %v103_v29 = vmul.f32 %v634_v9, %v102_v16 }
 0x122   :  { %v494_v60 = vmul.f32 %v636_v56, %v493_v57 }
 0x123   :  { %v104_v33 = vadd.f32 %v634_v9, %v103_v29 }
 0x124   :  { %v495_v52 = vmul.f32 0.5, %v494_v60 }
 0x125   :  { %v108_v41 = vsel %vm107_vm10, %v634_v9, %v104_v33 }
 0x126   :  { %v113_v48 = vsel %vm110_vm11, %v112_v38, %v108_v41  ;;  %v496_v63 = vsub.f32 1.5, %v495_v52 }
 0x127   :  { %v875_v26 = vmul.f32 %v799_v61, %v113_v48  ;;  %175 = vadd.xlane.f32.xlu1 %v174_v43  ;;  %172 = vadd.xlane.f32.xlu0 %v171_v44 }
 0x128   :  { %169 = vadd.xlane.f32.xlu2 %v168_v42  ;;  %v497_v1 = vmul.f32 %v636_v56, %v496_v63 }
 0x129   :  { %v123_v20 = vperm.slane %v875_v26, 0 }
 0x12a   :  { %v498_v2 = vmul.f32 %v497_v1, %v838_v55 }
 0x12b   :  { %v137_v45 = vmul.f32 %v123_v20, %v715_v14  ;;  %v136_v46 = vmul.f32 %v123_v20, %v709_v12  ;;  %v138_v47 = vmul.f32 %v123_v20, %v672_v0  ;;  %v139_v51 = vmul.f32 %v123_v20, %v724_v17 }
 0x12c   :  { %v500_v3 = vsel %vm499_vm12, %v838_v55, %v498_v2 }
 0x12d   :  { %v177_v61 = vsel %vm140_vm2, %v136_v46, 0.0  ;;  %v183_v49 = vsel %vm140_vm2, %v138_v47, 0.0  ;;  %v180_v50 = vsel %vm140_vm2, %v137_v45, 0.0  ;;  %v186_v53 = vsel %vm140_vm2, %v139_v51, 0.0 }
 0x12f   :  { %184 = vadd.xlane.f32.xlu1 %v183_v49  ;;  %181 = vadd.xlane.f32.xlu0 %v180_v50 }
 0x130   :  { %178 = vadd.xlane.f32.xlu2 %v177_v61 }
 0x138   :  { %187 = vadd.xlane.f32.xlu2 %v186_v53 }
 0x143   :  { %445 = vperm.xlu0 %611, %v767_v36   ;;  %v502_v36 = vand.u32 2147483648, %v838_v55 }
 0x148   :  { %441 = vperm.xlu1 %609, %v777_v40  }
 0x150   :  { %437 = vperm.xlu2 %610, %v754_v30   ;;  %v503_v30 = vsel %vm501_vm13, %v502_v36, %v500_v3 }
 0x151   :  { %v540_v40 = vsel %vm140_vm2, %v503_v30, 0.0 }
 0x179   :  { %541 = vadd.xlane.f32.xlu2 %v540_v40 }
 0x182   :  { %v149_v7 = vpop.xlane.xlu1 %148  ;;  %v146_v54 = vpop.xlane.xlu0 %145 }
 0x183   :  { %v191_v8 = vadd.f32 %v149_v7, %v672_v0  ;;  %v143_v9 = vpop.xlane.xlu2 %142  ;;  %v190_v10 = vadd.f32 %v146_v54, %v715_v14 }
 0x184   :  { %v189_v13 = vadd.f32 %v143_v9, %v709_v12 }
 0x185   :  { %v207_v16 = vmax.f32 %v191_v8, 0.0  ;;  %v206_v22 = vmax.f32 %v190_v10, 0.0 }
 0x186   :  { %v205_v24 = vmax.f32 %v189_v13, 0.0 }
 0x187   :  { %v238_v27 = vmul.f32 %v808_v5, %v206_v22  ;;  %v239_v55 = vmul.f32 %v796_v58, %v207_v16  ;;  %v411_v16 = vsel %vm140_vm2, %v817_v15, 0.0 }
 0x188   :  { %v237_v28 = vmul.f32 %v806_v4, %v205_v24  ;;  %v412_v24 = vrot.slane %v411_v16, 4 }
 0x189   :  { %v255_v29 = vsel %vm253_vm14, %v238_v27, 0.0  ;;  %v257_v38 = vsel %vm253_vm14, %v239_v55, 0.0  ;;  %v425_v55 = vsel %vm140_vm2, %v824_v23, 0.0 }
 0x18a   :  { %v254_v31 = vsel %vm253_vm14, %v237_v28, 0.0  ;;  %v158_v34 = vpop.xlane.xlu1 %157  ;;  %v155_v48 = vpop.xlane.xlu0 %154  ;;  %v413_v28 = vadd.f32 %v412_v24, %v411_v16 }
 0x18b   :  { %v256_v33 = vadd.f32 %v255_v29, %v254_v31  ;;  %v152_v37 = vpop.xlane.xlu2 %151  ;;  %v194_v39 = vadd.f32 %v158_v34, %v715_v14  ;;  %v193_v43 = vadd.f32 %v155_v48, %v709_v12  ;;  %v426_v29 = vrot.slane %v425_v55, 4 }
 0x18c   :  { %v192_v41 = vadd.f32 %v152_v37, %v724_v17  ;;  %v414_v34 = vrot.slane %v413_v28, 2 }
 0x18d   :  { %v258_v42 = vadd.f32 %v257_v38, %v256_v33  ;;  %v210_v44 = vmax.f32 %v194_v39, 0.0  ;;  %v209_v45 = vmax.f32 %v193_v43, 0.0  ;;  %v418_v33 = vsel %vm140_vm2, %v835_v35, 0.0 }
 0x18e   :  { %v208_v20 = vmax.f32 %v192_v41, 0.0  ;;  %v427_v37 = vadd.f32 %v426_v29, %v425_v55  ;;  %v419_v38 = vrot.slane %v418_v33, 4  ;;  %v415_v48 = vadd.f32 %v414_v34, %v413_v28 }
 0x18f   :  { %v242_v46 = vmul.f32 %v808_v5, %v210_v44  ;;  %v241_v61 = vmul.f32 %v806_v4, %v209_v45 }
 0x190   :  { %v240_v47 = vmul.f32 %v810_v6, %v208_v20  ;;  %v428_v43 = vrot.slane %v427_v37, 2  ;;  %v420_v44 = vadd.f32 %v419_v38, %v418_v33 }
 0x191   :  { %v268_v49 = vsel %vm253_vm14, %v242_v46, 0.0  ;;  %v267_v53 = vsel %vm253_vm14, %v241_v61, 0.0 }
 0x192   :  { %v259_v50 = vsel %vm253_vm14, %v240_v47, 0.0  ;;  %v269_v57 = vadd.f32 %v268_v49, %v267_v53  ;;  %v164_v52 = vpop.xlane.xlu0 %163  ;;  %v167_v9 = vpop.xlane.xlu1 %166  ;;  %v416_v47 = vrot.slane %v415_v48, 1  ;;  %v429_v35 = vadd.f32 %v428_v43, %v427_v37 }
 0x193   :  { %v917_v51 = vadd.f32 %v259_v50, %v258_v42  ;;  %v161_v56 = vpop.xlane.xlu2 %160  ;;  %v196_v63 = vadd.f32 %v164_v52, %v724_v17  ;;  %v421_v49 = vrot.slane %v420_v44, 2 }
 0x194   :  { %v195_v60 = vadd.f32 %v161_v56, %v672_v0  ;;  %v417_v52 = vadd.f32 %v416_v47, %v415_v48 }
 0x195   :  { %v212_v2 = vmax.f32 %v196_v63, 0.0  ;;  %v430_v63 = vrot.slane %v429_v35, 1 }
 0x196   :  { %v211_v1 = vmax.f32 %v195_v60, 0.0  ;;  %v481_v16 = vmul.f32 %v417_v52, %v417_v52 }
 0x197   :  { %v244_v36 = vmul.f32 %v810_v6, %v212_v2  ;;  %v422_v2 = vadd.f32 %v421_v49, %v420_v44  ;;  %v431_v24 = vadd.f32 %v430_v63, %v429_v35 }
 0x198   :  { %v243_v3 = vmul.f32 %v796_v58, %v211_v1 }
 0x199   :  { %v272_v54 = vsel %vm253_vm14, %v244_v36, 0.0  ;;  %v423_v55 = vrot.slane %v422_v2, 1 }
 0x19a   :  { %v270_v30 = vsel %vm253_vm14, %v243_v3, 0.0  ;;  %v173_v13 = vpop.xlane.xlu0 %172  ;;  %v932_v22 = vpop.xlane.xlu1 %175 }
 0x19b   :  { %v271_v40 = vadd.f32 %v270_v30, %v269_v57  ;;  %v170_v7 = vpop.xlane.xlu2 %169  ;;  %v424_v48 = vadd.f32 %v423_v55, %v422_v2 }
 0x19d   :  { %v926_v8 = vadd.f32 %v272_v54, %v271_v40  ;;  %v482_v35 = vmul.f32 %v424_v48, %v424_v48 }
 0x1a2   :  { %v182_v31 = vpop.xlane.xlu0 %181  ;;  %v940_v39 = vpop.xlane.xlu1 %184 }
 0x1a3   :  { %v928_v10 = vpop.xlane.xlu2 %178  ;;  %v202_v47 = vadd.f32 %v182_v31, %v715_v14 }
 0x1ab   :  { %v934_v27 = vpop.xlane.xlu2 %187 }
 0x1ac   :  { %v204_v2 = vadd.f32 %v934_v27, %v724_v17 }
 0x1b3   :  { %v438_v15 = vpop.permute.xlu2 %437 }
 0x1b4   :  { %v449_v41 = vmul.f32 %v438_v15, %v814_v11  ;;  %v197_v15 = vadd.f32 %v167_v9, %v709_v12  ;;  %v200_v9 = vadd.f32 %v932_v22, %v724_v17 }
 0x1b5   :  { %v446_v20 = vpop.permute.xlu0 %445 }
 0x1b6   :  { %v459_v42 = vsel %vm140_vm2, %v449_v41, 0.0  ;;  %v451_v45 = vmul.f32 %v446_v20, %v821_v19  ;;  %v483_v41 = vmul.f32 %v431_v24, %v431_v24  ;;  %v201_v20 = vadd.f32 %v928_v10, %v709_v12 }
 0x1b7   :  { %v460_v23 = vrot.slane %v459_v42, 4  ;;  %v648_v12 = vmov 8   ;;  %v216_v22 = vmax.f32 %v200_v9, 0.0 }
 0x1b8   :  { %v473_v61 = vsel %vm140_vm2, %v451_v45, 0.0  ;;  %612 = vset.pattern.permute.xlu1 %v648_v12  ;;  %613 = vset.pattern.permute.xlu2 %v648_v12 }
 0x1b9   :  { %v461_v46 = vadd.f32 %v460_v23, %v459_v42  ;;  %v474_v53 = vrot.slane %v473_v61, 4  ;;  %v199_v23 = vadd.f32 %v173_v13, %v672_v0  ;;  %614 = vset.pattern.permute.xlu0 %v648_v12 }
 0x1ba   :  { %v442_v56 = vpop.permute.xlu1 %441 }
 0x1bb   :  { %v462_v50 = vrot.slane %v461_v46, 2  ;;  %v450_v11 = vmul.f32 %v442_v56, %v832_v32  ;;  %v475_v60 = vadd.f32 %v474_v53, %v473_v61  ;;  %v198_v32 = vadd.f32 %v170_v7, %v715_v14 }
 0x1bc   :  { %v215_v13 = vmax.f32 %v199_v23, 0.0  ;;  %v217_v53 = vmax.f32 %v201_v20, 0.0  ;;  %v218_v14 = vmax.f32 %v202_v47, 0.0 }
 0x1bd   :  { %v463_v57 = vadd.f32 %v462_v50, %v461_v46  ;;  %v466_v1 = vsel %vm140_vm2, %v450_v11, 0.0  ;;  %v476_v19 = vrot.slane %v475_v60, 2  ;;  %v214_v44 = vmax.f32 %v198_v32, 0.0 }
 0x1be   :  { %v467_v36 = vrot.slane %v466_v1, 4  ;;  %v213_v46 = vmax.f32 %v197_v15, 0.0  ;;  %v247_v63 = vmul.f32 %v796_v58, %v215_v13 }
 0x1bf   :  { %v464_v3 = vrot.slane %v463_v57, 1  ;;  %v477_v40 = vadd.f32 %v476_v19, %v475_v60  ;;  %v246_v49 = vmul.f32 %v808_v5, %v214_v44  ;;  %v250_v19 = vmul.f32 %v808_v5, %v218_v14 }
 0x1c0   :  { %v468_v54 = vadd.f32 %v467_v36, %v466_v1  ;;  %v245_v10 = vmul.f32 %v806_v4, %v213_v46  ;;  %v249_v1 = vmul.f32 %v806_v4, %v217_v53  ;;  %v283_v55 = vsel %vm253_vm14, %v247_v63, 0.0 }
 0x1c1   :  { %v465_v30 = vadd.f32 %v464_v3, %v463_v57  ;;  %v478_v29 = vrot.slane %v477_v40, 1  ;;  %v281_v11 = vsel %vm253_vm14, %v246_v49, 0.0  ;;  %v203_v57 = vadd.f32 %v940_v39, %v672_v0 }
 0x1c2   :  { %v469_v33 = vrot.slane %v468_v54, 2  ;;  %v280_v3 = vsel %vm253_vm14, %v245_v10, 0.0  ;;  %v293_v4 = vsel %vm253_vm14, %v249_v1, 0.0  ;;  %v294_v17 = vsel %vm253_vm14, %v250_v19, 0.0 }
 0x1c3   :  { %v485_v28 = vmul.f32 %v465_v30, %v465_v30  ;;  %v479_v37 = vadd.f32 %v478_v29, %v477_v40  ;;  %v282_v40 = vadd.f32 %v281_v11, %v280_v3  ;;  %v219_v0 = vmax.f32 %v203_v57, 0.0 }
 0x1c4   :  { %v470_v38 = vadd.f32 %v469_v33, %v468_v54  ;;  %v248_v54 = vmul.f32 %v810_v6, %v216_v22  ;;  %v295_v48 = vadd.f32 %v294_v17, %v293_v4  ;;  %v274_v53 = vrot.slane %v926_v8, 4 }
 0x1c5   :  { %v949_v34 = vadd.f32 %v485_v28, %v481_v16  ;;  %v487_v42 = vmul.f32 %v479_v37, %v479_v37  ;;  %v220_v28 = vmax.f32 %v204_v2, 0.0  ;;  %v284_v32 = vadd.f32 %v283_v55, %v282_v40 }
 0x1c6   :  { %v471_v43 = vrot.slane %v470_v38, 1  ;;  %v285_v33 = vsel %vm253_vm14, %v248_v54, 0.0  ;;  %v251_v37 = vmul.f32 %v796_v58, %v219_v0  ;;  %v261_v58 = vrot.slane %v917_v51, 4 }
 0x1c7   :  { %637 = vrsqrt.f32 %v949_v34  ;;  %v956_v45 = vadd.f32 %v487_v42, %v483_v41  ;;  %v252_v42 = vmul.f32 %v810_v6, %v220_v28  ;;  %vm511_vm15 = vcmp.eq.f32.partialorder %v949_v34, inf }
 0x1c8   :  { %v472_v7 = vadd.f32 %v471_v43, %v470_v38  ;;  %v514_v43 = vand.u32 2147483648, %v949_v34  ;;  %vm513_vm0 = vcmp.eq.f32.partialorder %v949_v34, 0.0  ;;  %v296_v6 = vsel %vm253_vm14, %v251_v37, 0.0 }
 0x1c9   :  { %639 = vrsqrt.f32 %v956_v45  ;;  %vm535_vm1 = vcmp.eq.f32.partialorder %v956_v45, inf  ;;  %v297_v49 = vadd.f32 %v296_v6, %v295_v48  ;;  %vm537_vm3 = vcmp.eq.f32.partialorder %v956_v45, 0.0 }
 0x1ca   :  { %v486_v61 = vmul.f32 %v472_v7, %v472_v7  ;;  %v286_v7 = vadd.f32 %v285_v33, %v284_v32  ;;  %v262_v14 = vadd.f32 %v261_v58, %v917_v51 }
 0x1cc   :  { %v963_v56 = vadd.f32 %v486_v61, %v482_v35  ;;  %v298_v61 = vsel %vm253_vm14, %v252_v42, 0.0  ;;  %v287_v12 = vrot.slane %v286_v7, 4  ;;  %v263_v2 = vrot.slane %v262_v14, 2 }
 0x1cd   :  { %v638_v50 = vpop.eup %637 }
 0x1ce   :  { %v505_v31 = vmul.f32 %v638_v50, %v949_v34  ;;  %641 = vrsqrt.f32 %v963_v56  ;;  %vm523_vm4 = vcmp.eq.f32.partialorder %v963_v56, inf  ;;  %v526_v57 = vand.u32 2147483648, %v963_v56 }
 0x1cf   :  { %v640_v52 = vpop.eup %639  ;;  %vm525_vm5 = vcmp.eq.f32.partialorder %v963_v56, 0.0  ;;  %v288_v63 = vadd.f32 %v287_v12, %v286_v7 }
 0x1d0   :  { %v506_v60 = vmul.f32 %v638_v50, %v505_v31  ;;  %v529_v30 = vmul.f32 %v640_v52, %v956_v45  ;;  %v299_v31 = vadd.f32 %v298_v61, %v297_v49 }
 0x1d1   :  { %v289_v19 = vrot.slane %v288_v63, 2 }
 0x1d2   :  { %v507_v36 = vmul.f32 0.5, %v506_v60  ;;  %v530_v16 = vmul.f32 %v640_v52, %v529_v30  ;;  %v300_v1 = vrot.slane %v299_v31, 4  ;;  %v264_v30 = vadd.f32 %v263_v2, %v262_v14 }
 0x1d3   :  { %v290_v54 = vadd.f32 %v289_v19, %v288_v63 }
 0x1d4   :  { %v508_v39 = vsub.f32 1.5, %v507_v36  ;;  %v642_v24 = vpop.eup %641  ;;  %v531_v29 = vmul.f32 0.5, %v530_v16  ;;  %v301_v36 = vadd.f32 %v300_v1, %v299_v31  ;;  %v265_v0 = vrot.slane %v264_v30, 1 }
 0x1d5   :  { %v517_v5 = vmul.f32 %v642_v24, %v963_v56 }
 0x1d6   :  { %v509_v27 = vmul.f32 %v638_v50, %v508_v39  ;;  %v532_v15 = vsub.f32 1.5, %v531_v29  ;;  %v302_v39 = vrot.slane %v301_v36, 2 }
 0x1d7   :  { %v518_v41 = vmul.f32 %v642_v24, %v517_v5 }
 0x1d8   :  { %v510_v38 = vmul.f32 %v509_v27, %v949_v34  ;;  %v533_v23 = vmul.f32 %v640_v52, %v532_v15  ;;  %v303_v55 = vadd.f32 %v302_v39, %v301_v36 }
 0x1d9   :  { %v519_v20 = vmul.f32 0.5, %v518_v41 }
 0x1da   :  { %v512_v44 = vsel %vm511_vm15, %v949_v34, %v510_v38  ;;  %v534_v35 = vmul.f32 %v533_v23, %v956_v45  ;;  %v538_v34 = vand.u32 2147483648, %v956_v45  ;;  %v304_v17 = vrot.slane %v303_v55, 1 }
 0x1db   :  { %v515_v46 = vsel %vm513_vm0, %v514_v43, %v512_v44  ;;  %v520_v9 = vsub.f32 1.5, %v519_v20 }
 0x1dc   :  { %v543_v47 = vsel %vm140_vm2, %v515_v46, 0.0  ;;  %v536_v50 = vsel %vm535_vm1, %v956_v45, %v534_v35  ;;  %v275_v45 = vadd.f32 %v274_v53, %v926_v8  ;;  %v305_v5 = vadd.f32 %v304_v17, %v303_v55 }
 0x1dd   :  { %544 = vadd.xlane.f32.xlu1 %v543_v47  ;;  %v521_v13 = vmul.f32 %v642_v24, %v520_v9  ;;  %v539_v10 = vsel %vm537_vm3, %v538_v34, %v536_v50  ;;  %v291_v24 = vrot.slane %v290_v54, 1 }
 0x1de   :  { %v549_v22 = vsel %vm140_vm2, %v539_v10, 0.0  ;;  %v276_v3 = vrot.slane %v275_v45, 2  ;;  %v313_v33 = vadd.f32 %v801_v62, %v305_v5 }
 0x1df   :  { %v522_v11 = vmul.f32 %v521_v13, %v963_v56  ;;  %550 = vadd.xlane.f32.xlu2 %v549_v22  ;;  %v292_v4 = vadd.f32 %v291_v24, %v290_v54 }
 0x1e0   :  { %v277_v40 = vadd.f32 %v276_v3, %v275_v45 }
 0x1e1   :  { %v524_v60 = vsel %vm523_vm4, %v963_v56, %v522_v11  ;;  %v266_v56 = vadd.f32 %v265_v0, %v264_v30  ;;  %v312_v29 = vadd.f32 %v801_v62, %v292_v4 }
 0x1e2   :  { %v527_v52 = vsel %vm525_vm5, %v526_v57, %v524_v60  ;;  %v278_v16 = vrot.slane %v277_v40, 1 }
 0x1e3   :  { %v546_v51 = vsel %vm140_vm2, %v527_v52, 0.0  ;;  %v310_v28 = vadd.f32 %v801_v62, %v266_v56  ;;  %vm553_vm2 = vcmp.eq.s32.totalorder %v726_v18, 9 }
 0x1e4   :  { %547 = vadd.xlane.f32.xlu0 %v546_v51  ;;  %v279_v8 = vadd.f32 %v278_v16, %v277_v40 }
 0x1e6   :  { %v311_v27 = vadd.f32 %v801_v62, %v279_v8 }
 0x1ec   :  { %v542_v32 = vpop.xlane.xlu2 %541 }
 0x1f6   :  { %556 = vperm.xlu1 %612, %v310_v28  }
 0x1f7   :  { %561 = vperm.xlu2 %613, %v311_v27  }
 0x1f8   :  { %566 = vperm.xlu0 %614, %v312_v29  }
 0x1fe   :  { %571 = vperm.xlu1 %612, %v313_v33  }
 0x250   :  { %v545_v15 = vpop.xlane.xlu1 %544 }
 0x252   :  { %v551_v37 = vpop.xlane.xlu2 %550 }
 0x257   :  { %v548_v62 = vpop.xlane.xlu0 %547 }
 0x25a   :  { %v562_v38 = vpop.permute.xlu2 %561 }
 0x25b   :  { %v575_v41 = vsel %vm553_vm2, %v562_v38, %v851_v21 }
 0x25c   :  { %v579_v48 = vsel %vm552_vm6, %v545_v15, %v575_v41 }
 0x25d   :  { %583 = vst [vmem:[%s1051_s3 + $0x1] sm:$0x1] %v579_v48 }
 0x268   :  { %v557_v42 = vpop.permute.xlu1 %556 }
 0x269   :  { %v574_v43 = vsel %vm553_vm2, %v557_v42, %v841_v25 }
 0x26a   :  { %v578_v44 = vsel %vm552_vm6, %v542_v32, %v574_v43  ;;  %v567_v21 = vpop.permute.xlu0 %566 }
 0x26b   :  { %582 = vst [vmem:[%s1051_s3] sm:$0x1] %v578_v44  ;;  %v576_v23 = vsel %vm553_vm2, %v567_v21, %v857_v59 }
 0x26c   :  { %v580_v20 = vsel %vm552_vm6, %v548_v62, %v576_v23 }
 0x26d   :  { %584 = vst [vmem:[%s1051_s3 + $0x2] sm:$0x1] %v580_v20 }
 0x270   :  { %v572_v25 = vpop.permute.xlu1 %571 }
 0x271   :  { %v577_v7 = vsel %vm553_vm2, %v572_v25, %v875_v26 }
 0x272   :  { %v581_v46 = vsel %vm552_vm6, %v551_v37, %v577_v7 }
 0x273   :  { %585 = vst [vmem:[%s1051_s3 + $0x3] sm:$0x1] %v581_v46 }

</bundles_post_ra>
